<compile_context>
chip_gen: v6e
topology: v6e:2x2x1
jax: 0.10.0
libtpu: 0.0.40
codegen_flags: <defaults>
</compile_context>

<pallas_src>
import jax
import jax.numpy as jnp
from jax.experimental import pallas as pl
from jax.experimental.pallas import tpu as pltpu

# ----------------------------- model hyperparams -----------------------------
B = 2                      # batch
H = 16                     # image height
W = 16                     # image width
HW = H * W                 # 256 (lane-dense spatial axis)
C_OUT = 8                  # encoder output channels
N_CLASS = 4                # nClass
N_PAD = 8                  # classifier outputs padded 4 -> 8 (sublane axis)
FEAT = C_OUT * HW          # 2048 flattened feature size (torch (C,H,W) order)
TAPS = 10                  # 9 conv taps + 1 constant-one "bias tap"


# ------------------------------ fused Pallas kernel ---------------------------
def fused_forward_kernel(patches_ref, cwbd_ref, fcw_ref, fcb_ref, out_ref):
    """Conv(3x3, same) + bias + ReLU -> flatten -> Linear + bias -> Sigmoid.

    patches_ref: (B*TAPS, HW)       im2col patches, rows ordered [b, tap]; tap 9 is all-ones
    cwbd_ref   : (B*C_OUT, B*TAPS)  block-diagonal conv weights (conv bias folded as tap 9)
    fcw_ref    : (N_PAD, C_OUT, HW) FC weight: fcw[n, c, hw] == W_fc[c*HW + hw, n]
    fcb_ref    : (N_PAD, 1)         FC bias (padded), column layout
    out_ref    : (N_PAD, B)         sigmoid(logits), transposed (wrapper slices/transposes)
    """
    # ---- encoder: the whole batch's 3x3 conv as ONE MXU matmul ---------------
    # (B*C_OUT, B*TAPS) @ (B*TAPS, HW) -> (B*C_OUT, HW); block-diagonal weight keeps
    # batches independent, and the result is already in torch (c, h, w) flatten order
    # per batch (rows b*C_OUT .. b*C_OUT+7 are batch b's channels).
    fm = jnp.dot(cwbd_ref[...], patches_ref[...],
                 preferred_element_type=jnp.float32)          # (B*C_OUT, HW)
    fm = jnp.maximum(fm, 0.0)                                  # ReLU

    # ---- classifier: contract (c, hw) per batch on the VPU/XLU ---------------
    # z[b, n] = sum_{c,hw} fm[b*C_OUT + c, hw] * fcw[n, c, hw]
    fcw = fcw_ref[...]                                         # (N_PAD, C_OUT, HW)
    cols = []
    for b in range(B):                                         # static unroll, B == 2
        fm_b = fm[b * C_OUT:(b + 1) * C_OUT, :]                # (C_OUT, HW) aligned slice
        prod = fcw * fm_b[None, :, :]                          # (N_PAD, C_OUT, HW)
        z_b = jnp.sum(jnp.sum(prod, axis=2), axis=1,
                      keepdims=True)                           # (N_PAD, 1)
        cols.append(z_b)
    z = jnp.concatenate(cols, axis=1) + fcb_ref[...]           # (N_PAD, B)
    out_ref[...] = 1.0 / (1.0 + jnp.exp(-z))                   # sigmoid (exp -> EUP)


# ------------------------- one-time parameter preparation ----------------------
def prepare_params(params):
    """Layout prep that depends only on params; hoisted out of the per-call path."""
    cw = jnp.concatenate([params["conv_w"].reshape(C_OUT, 9),
                          params["conv_b"].reshape(C_OUT, 1)], axis=1)       # (C_OUT, TAPS)
    cw_bd = jnp.kron(jnp.eye(B, dtype=jnp.float32), cw)                      # (B*C_OUT, B*TAPS)
    fcw_t = jnp.pad(params["fc_w"].T, ((0, N_PAD - N_CLASS), (0, 0)))        # (N_PAD, FEAT)
    fcw_r = fcw_t.reshape(N_PAD, C_OUT, HW)                                  # (N_PAD, C_OUT, HW)
    fcb_c = jnp.pad(params["fc_b"], (0, N_PAD - N_CLASS)).reshape(N_PAD, 1)  # (N_PAD, 1)
    return cw_bd, fcw_r, fcb_c


# ------------------------------- per-call wrapper ------------------------------
@jax.jit
def base_model_forward(imgs_nchw, cw_bd, fcw_r, fcb_c):
    """Full flow: Images (B,1,H,W) -> Encoder -> Flatten -> MLP -> Sigmoid."""
    # im2col layout plumbing (cheap XLA glue); all arithmetic runs in the kernel.
    x = imgs_nchw[:, 0]                                    # (B, H, W), single in-channel
    xpad = jnp.pad(x, ((0, 0), (1, 1), (1, 1)))            # 'same' zero padding
    taps = [xpad[:, dy:dy + H, dx:dx + W].reshape(B, 1, HW)
            for dy in range(3) for dx in range(3)]
    taps.append(jnp.ones((B, 1, HW), jnp.float32))         # constant tap -> conv bias
    patches = jnp.concatenate(taps, axis=1).reshape(B * TAPS, HW)   # (B*TAPS, HW)

    out_t = pl.pallas_call(
        fused_forward_kernel,
        out_shape=jax.ShapeDtypeStruct((N_PAD, B), jnp.float32),
        grid=(1,),
        in_specs=[
            pl.BlockSpec((B * TAPS, HW), lambda i: (0, 0)),
            pl.BlockSpec((B * C_OUT, B * TAPS), lambda i: (0, 0)),
            pl.BlockSpec((N_PAD, C_OUT, HW), lambda i: (0, 0, 0)),
            pl.BlockSpec((N_PAD, 1), lambda i: (0, 0)),
        ],
        out_specs=pl.BlockSpec((N_PAD, B), lambda i: (0, 0)),
        compiler_params=pltpu.CompilerParams(dimension_semantics=("arbitrary",)),
    )(patches, cw_bd, fcw_r, fcb_c)

    return out_t[:N_CLASS, :].T                            # (B, N_CLASS)


# ------------------------------ reference (pure JAX) ---------------------------
def reference_forward(imgs_nchw, params):
    xpad = jnp.pad(imgs_nchw[:, 0, :, :], ((0, 0), (1, 1), (1, 1)))
    fm = jnp.zeros((B, C_OUT, H, W), jnp.float32)
    for dy in range(3):
        for dx in range(3):
            patch = xpad[:, dy:dy + H, dx:dx + W]                    # (B, H, W)
            fm = fm + params["conv_w"][None, :, dy, dx, None, None] * patch[:, None, :, :]
    fm = jnp.maximum(fm + params["conv_b"][None, :, None, None], 0.0)
    x = fm.reshape(B, FEAT)                                          # torch .view(b, -1)
    z = x @ params["fc_w"] + params["fc_b"][None, :]
    return jax.nn.sigmoid(z)


# ---------------------------------- main ---------------------------------------
if __name__ == "__main__":
    key = jax.random.PRNGKey(0)
    k_img, k_cw, k_cb, k_fw, k_fb = jax.random.split(key, 5)

    imgs = jax.random.normal(k_img, (B, 1, H, W), dtype=jnp.float32)

    params = {
        "conv_w": 0.1 * jax.random.normal(k_cw, (C_OUT, 3, 3), dtype=jnp.float32),
        "conv_b": 0.01 * jax.random.normal(k_cb, (C_OUT,), dtype=jnp.float32),
        "fc_w": 0.02 * jax.random.normal(k_fw, (FEAT, N_CLASS), dtype=jnp.float32),
        "fc_b": 0.01 * jax.random.normal(k_fb, (N_CLASS,), dtype=jnp.float32),
    }

    cw_bd, fcw_r, fcb_c = prepare_params(params)           # one-time layout prep

    out = base_model_forward(imgs, cw_bd, fcw_r, fcb_c)
    out = jax.block_until_ready(out)

    ref = reference_forward(imgs, params)
    assert out.shape == (B, N_CLASS)
    assert jnp.max(jnp.abs(out - ref)) < 2e-5

    print("KERNEL_OK")
</pallas_src>

<mosaic_0001>
module attributes {stable_mosaic.version = 11 : i64} {
  func.func @fused_forward_kernel(%arg0: i32, %arg1: memref<20x256xf32, #tpu.memory_space<vmem>>, %arg2: memref<16x20xf32, #tpu.memory_space<vmem>>, %arg3: memref<8x8x256xf32, #tpu.memory_space<vmem>>, %arg4: memref<8x1xf32, #tpu.memory_space<vmem>>, %arg5: memref<8x2xf32, #tpu.memory_space<vmem>>) attributes {dimension_semantics = [#tpu.dimension_semantics<arbitrary>], iteration_bounds = array<i64: 1>, scalar_prefetch = 0 : i64, scratch_operands = 0 : i64, tpu.core_type = #tpu.core_type<tc>, window_params = [{pipeline_mode = #tpu.pipeline_mode<synchronous>, transform_indices = @transform_0, window_bounds = array<i64: 20, 256>}, {pipeline_mode = #tpu.pipeline_mode<synchronous>, transform_indices = @transform_1, window_bounds = array<i64: 16, 20>}, {pipeline_mode = #tpu.pipeline_mode<synchronous>, transform_indices = @transform_2, window_bounds = array<i64: 8, 8, 256>}, {pipeline_mode = #tpu.pipeline_mode<synchronous>, transform_indices = @transform_3, window_bounds = array<i64: 8, 1>}, {pipeline_mode = #tpu.pipeline_mode<synchronous>, transform_indices = @transform_4, window_bounds = array<i64: 8, 2>}]} {
    %c0 = arith.constant 0 : index
    %c0_0 = arith.constant 0 : index
    %0 = vector.load %arg2[%c0, %c0_0] : memref<16x20xf32, #tpu.memory_space<vmem>>, vector<16x20xf32>
    %c0_1 = arith.constant 0 : index
    %c0_2 = arith.constant 0 : index
    %1 = vector.load %arg1[%c0_1, %c0_2] : memref<20x256xf32, #tpu.memory_space<vmem>>, vector<20x256xf32>
    %cst = arith.constant dense<0.000000e+00> : vector<16x256xf32>
    %2 = tpu.matmul %0, %1, %cst {dimension_numbers = #tpu.dot_dimension_numbers<[1], [0], [0], [1], [0, 0, 1, 1], [], []>} : vector<16x20xf32>, vector<20x256xf32>, vector<16x256xf32> -> vector<16x256xf32>
    %cst_3 = arith.constant 0.000000e+00 : f32
    %3 = vector.broadcast %cst_3 : f32 to vector<16x256xf32>
    %4 = arith.maximumf %2, %3 : vector<16x256xf32>
    %c0_4 = arith.constant 0 : index
    %c0_5 = arith.constant 0 : index
    %c0_6 = arith.constant 0 : index
    %5 = vector.load %arg3[%c0_4, %c0_5, %c0_6] : memref<8x8x256xf32, #tpu.memory_space<vmem>>, vector<8x8x256xf32>
    %6 = vector.extract_strided_slice %4 {offsets = [0, 0], sizes = [8, 256], strides = [1, 1]} : vector<16x256xf32> to vector<8x256xf32>
    %7 = vector.shape_cast %6 : vector<8x256xf32> to vector<1x8x256xf32>
    %8 = vector.broadcast %7 : vector<1x8x256xf32> to vector<8x8x256xf32>
    %9 = arith.mulf %5, %8 : vector<8x8x256xf32>
    %cst_7 = arith.constant dense<0.000000e+00> : vector<8x8xf32>
    %10 = vector.multi_reduction <add>, %9, %cst_7 [2] : vector<8x8x256xf32> to vector<8x8xf32>
    %cst_8 = arith.constant dense<0.000000e+00> : vector<8xf32>
    %11 = vector.multi_reduction <add>, %10, %cst_8 [1] : vector<8x8xf32> to vector<8xf32>
    %12 = vector.shape_cast %11 : vector<8xf32> to vector<8x1xf32>
    %13 = vector.extract_strided_slice %4 {offsets = [8, 0], sizes = [8, 256], strides = [1, 1]} : vector<16x256xf32> to vector<8x256xf32>
    %14 = vector.shape_cast %13 : vector<8x256xf32> to vector<1x8x256xf32>
    %15 = vector.broadcast %14 : vector<1x8x256xf32> to vector<8x8x256xf32>
    %16 = arith.mulf %5, %15 : vector<8x8x256xf32>
    %cst_9 = arith.constant dense<0.000000e+00> : vector<8x8xf32>
    %17 = vector.multi_reduction <add>, %16, %cst_9 [2] : vector<8x8x256xf32> to vector<8x8xf32>
    %cst_10 = arith.constant dense<0.000000e+00> : vector<8xf32>
    %18 = vector.multi_reduction <add>, %17, %cst_10 [1] : vector<8x8xf32> to vector<8xf32>
    %19 = vector.shape_cast %18 : vector<8xf32> to vector<8x1xf32>
    %20 = tpu.concatenate %12, %19 in 1 : vector<8x1xf32>, vector<8x1xf32> -> vector<8x2xf32>
    %c0_11 = arith.constant 0 : index
    %c0_12 = arith.constant 0 : index
    %21 = vector.load %arg4[%c0_11, %c0_12] : memref<8x1xf32, #tpu.memory_space<vmem>>, vector<8x1xf32>
    %22 = vector.broadcast %21 : vector<8x1xf32> to vector<8x2xf32>
    %23 = arith.addf %20, %22 : vector<8x2xf32>
    %cst_13 = arith.constant 0.000000e+00 : f32
    %24 = vector.broadcast %cst_13 : f32 to vector<8x2xf32>
    %25 = arith.subf %24, %23 : vector<8x2xf32>
    %26 = math.exp %25 : vector<8x2xf32>
    %cst_14 = arith.constant 1.000000e+00 : f32
    %27 = vector.broadcast %cst_14 : f32 to vector<8x2xf32>
    %28 = arith.addf %27, %26 : vector<8x2xf32>
    %cst_15 = arith.constant 1.000000e+00 : f32
    %29 = vector.broadcast %cst_15 : f32 to vector<8x2xf32>
    %30 = arith.divf %29, %28 : vector<8x2xf32>
    %c0_16 = arith.constant 0 : index
    %c0_17 = arith.constant 0 : index
    %31 = vector.load %arg5[%c0_16, %c0_17] : memref<8x2xf32, #tpu.memory_space<vmem>>, vector<8x2xf32>
    tpu.vector_store %arg5[%c0_16, %c0_17], %30 {strides = array<i32>} : memref<8x2xf32, #tpu.memory_space<vmem>>, vector<8x2xf32>,
    return
  }
  func.func @transform_0(%arg0: i32) -> (i32, i32) {
    %c0_i32 = arith.constant 0 : i32
    %c0_i32_0 = arith.constant 0 : i32
    %c0_i32_1 = arith.constant 0 : i32
    return %c0_i32, %c0_i32_0 : i32, i32
  }
  func.func @transform_1(%arg0: i32) -> (i32, i32) {
    %c0_i32 = arith.constant 0 : i32
    %c0_i32_0 = arith.constant 0 : i32
    %c0_i32_1 = arith.constant 0 : i32
    return %c0_i32, %c0_i32_0 : i32, i32
  }
  func.func @transform_2(%arg0: i32) -> (i32, i32, i32) {
    %c0_i32 = arith.constant 0 : i32
    %c0_i32_0 = arith.constant 0 : i32
    %c0_i32_1 = arith.constant 0 : i32
    %c0_i32_2 = arith.constant 0 : i32
    return %c0_i32, %c0_i32_0, %c0_i32_1 : i32, i32, i32
  }
  func.func @transform_3(%arg0: i32) -> (i32, i32) {
    %c0_i32 = arith.constant 0 : i32
    %c0_i32_0 = arith.constant 0 : i32
    %c0_i32_1 = arith.constant 0 : i32
    return %c0_i32, %c0_i32_0 : i32, i32
  }
  func.func @transform_4(%arg0: i32) -> (i32, i32) {
    %c0_i32 = arith.constant 0 : i32
    %c0_i32_0 = arith.constant 0 : i32
    %c0_i32_1 = arith.constant 0 : i32
    return %c0_i32, %c0_i32_0 : i32, i32
  }
}

</mosaic_0001>

<bundles_post_ra>
// kernel: base_model_forward.1
= control target key start
LH: loop header
LB: loop body
LE: loop exit
PB: predicated region body
PF: predicated region fallthrough
CT: control target
= control target key end

     0   :  { %vm32_vm0 = vcmask 1043456   ;;  %v366_v3 = vmov 0.0   ;;  %vm25_vm1 = vcmask 162816   ;;  %vm218_vm2 = vcmask 1041409   ;;  %s519_s0 = inlined_call_operand.vmem [shape: f32[20,256], index: 0, kind: input, shape index: {}]   ;;  %s520_s1 = inlined_call_operand.vmem [shape: f32[16,20], index: 1, kind: input, shape index: {}]   ;;  %s521_s2 = inlined_call_operand.vmem [shape: f32[8,8,256], index: 2, kind: input, shape index: {}]   ;;  %s522_s3 = inlined_call_operand.vmem [shape: f32[8,1], index: 3, kind: input, shape index: {}]   ;;  %s523_s4 = inlined_call_operand.vmem [shape: f32[8,2], index: 4, kind: output, shape index: {}]  }
   0x1   :  { %v24_v0 = vld [vmem:[%s519_s0 + $0x28] sm:$0xf]  ;;  %v23_v1 = vld [vmem:[%s519_s0 + $0x20] sm:$0xf]  ;;  %v22_v2 = vld [vmem:[%s519_s0 + $0x18] sm:$0xff]  ;;  %103 = vmatprep.mubr.f32.mxu0 %v366_v3  ;;  %109 = vmatprep.mubr.f32.mxu1 %v366_v3  ;;  %vm220_vm3 = vcmask 1042434  }
   0x2   :  { %349 = vmatprep.subr.msk.mxu0 %vm32_vm0, %v24_v0  ;;  %353 = vmatprep.subr.msk.mxu1 %vm32_vm0, %v24_v0  ;;  %v21_v4 = vld [vmem:[%s519_s0 + $0x10] sm:$0xff]  ;;  %v20_v5 = vld [vmem:[%s519_s0 + $0x8] sm:$0xff]  ;;  %v19_v6 = vld [vmem:[%s519_s0] sm:$0xff]  ;;  %vm222_vm4 = vcmask 1043459   ;;  %vm224_vm5 = vcmask 1044484   ;;  %vm226_vm6 = vcmask 1045509  }
   0x3   :  { %350 = vmatpush1.msk.msra.mxu0 %vm32_vm0, %v23_v1  ;;  %356 = vmatpush1.msk.msra.mxu1 %vm32_vm0, %v23_v1  ;;  %v17_v7 = vld [vmem:[%s520_s1] sm:$0xff]  ;;  %v18_v8 = vld [vmem:[%s520_s1 + $0x8] sm:$0xff]  ;;  %v122_v21 = vld [vmem:[%s521_s2 + $0x10] sm:$0xff]  ;;  %vm228_vm7 = vcmask 1046534   ;;  %vm230_vm8 = vcmask 1047559   ;;  %vm233_vm9 = vcmask 64512  }
   0x4   :  { %67 = vmatprep.subr.mxu0 %v22_v2  ;;  %354 = vmatprep.subr.mxu1 %v22_v2  ;;  %v120_v13 = vld [vmem:[%s521_s2] sm:$0xff]  ;;  %v121_v16 = vld [vmem:[%s521_s2 + $0x8] sm:$0xff]  ;;  %v123_v22 = vld [vmem:[%s521_s2 + $0x18] sm:$0xff]  ;;  %vm328_vm10 = vcmask 7168   ;;  %vm343_vm11 = vcmask 15360  }
   0x5   :  { %68 = vmatpush1.msra.mxu0 %v21_v4  ;;  %357 = vmatpush1.msra.mxu1 %v21_v4  ;;  %v125_v30 = vld [vmem:[%s521_s2 + $0x28] sm:$0xff]  ;;  %v124_v33 = vld [vmem:[%s521_s2 + $0x20] sm:$0xff]  ;;  %v127_v38 = vld [vmem:[%s521_s2 + $0x38] sm:$0xff] }
   0x6   :  { %69 = vmatprep.subr.mxu0 %v20_v5  ;;  %355 = vmatprep.subr.mxu1 %v20_v5  ;;  %v126_v40 = vld [vmem:[%s521_s2 + $0x30] sm:$0xff]  ;;  %v129_v46 = vld [vmem:[%s521_s2 + $0x48] sm:$0xff]  ;;  %v128_v49 = vld [vmem:[%s521_s2 + $0x40] sm:$0xff] }
   0x7   :  { %70 = vmatpush1.msra.mxu0 %v19_v6  ;;  %358 = vmatpush1.msra.mxu1 %v19_v6  ;;  %v131_v54 = vld [vmem:[%s521_s2 + $0x58] sm:$0xff]  ;;  %v130_v56 = vld [vmem:[%s521_s2 + $0x50] sm:$0xff]  ;;  %v133_v62 = vld [vmem:[%s521_s2 + $0x68] sm:$0xff] }
   0x8   :  { %351 = vmatmul.mubr.msk.f32.vlgmr.msra.gmra.mxu0 %vm25_vm1, %v17_v7  ;;  %352 = vmatmul.mubr.msk.f32.vlgmr.msra.gmra.mxu1 %vm25_vm1, %v18_v8  ;;  %v132_v0 = vld [vmem:[%s521_s2 + $0x60] sm:$0xff]  ;;  %v135_v6 = vld [vmem:[%s521_s2 + $0x78] sm:$0xff] }
  0xc8   :  { %v105_v9 = vpop.f32.mrf.mxu0  ;;  %v111_v10 = vpop.f32.mrf.mxu1 }
  0xc9   :  { %v417_v11 = vmax.f32 %v105_v9, 0.0  ;;  %v419_v12 = vmax.f32 %v111_v10, 0.0  ;;  %v134_v9 = vld [vmem:[%s521_s2 + $0x70] sm:$0xff] }
  0xca   :  { %v107_v14 = vpop.f32.mrf.mxu0  ;;  %v113_v15 = vpop.f32.mrf.mxu1 }
  0xcb   :  { %v427_v17 = vmax.f32 %v107_v14, 0.0  ;;  %v429_v18 = vmax.f32 %v113_v15, 0.0  ;;  %v237_v19 = vmul.f32 %v120_v13, %v419_v12  ;;  %v136_v20 = vmul.f32 %v120_v13, %v417_v11 }
  0xcc   :  { %v239_v25 = vmul.f32 %v122_v21, %v419_v12  ;;  %v138_v32 = vmul.f32 %v122_v21, %v417_v11  ;;  %v241_v35 = vmul.f32 %v124_v33, %v419_v12  ;;  %v140_v39 = vmul.f32 %v124_v33, %v417_v11 }
  0xcd   :  { %v238_v23 = vmul.f32 %v121_v16, %v429_v18  ;;  %v137_v24 = vmul.f32 %v121_v16, %v427_v17  ;;  %v240_v26 = vmul.f32 %v123_v22, %v429_v18  ;;  %v139_v29 = vmul.f32 %v123_v22, %v427_v17 }
  0xce   :  { %v242_v36 = vmul.f32 %v125_v30, %v429_v18  ;;  %v141_v37 = vmul.f32 %v125_v30, %v427_v17  ;;  %v243_v41 = vmul.f32 %v126_v40, %v419_v12  ;;  %v244_v42 = vmul.f32 %v127_v38, %v429_v18 }
  0xcf   :  { %v253_v27 = vadd.f32 %v238_v23, %v237_v19  ;;  %v152_v28 = vadd.f32 %v137_v24, %v136_v20  ;;  %v256_v31 = vadd.f32 %v240_v26, %v239_v25  ;;  %v155_v34 = vadd.f32 %v139_v29, %v138_v32 }
  0xd0   :  { %v259_v43 = vadd.f32 %v242_v36, %v241_v35  ;;  %v158_v44 = vadd.f32 %v141_v37, %v140_v39  ;;  %v143_v45 = vmul.f32 %v127_v38, %v427_v17  ;;  %v142_v47 = vmul.f32 %v126_v40, %v417_v11 }
  0xd1   :  { %254 = vadd.xlane.f32.xlu1 %v253_v27  ;;  %153 = vadd.xlane.f32.xlu0 %v152_v28  ;;  %v262_v48 = vadd.f32 %v244_v42, %v243_v41  ;;  %v245_v51 = vmul.f32 %v128_v49, %v419_v12  ;;  %v246_v52 = vmul.f32 %v129_v46, %v429_v18  ;;  %v367_v21 = vmov 0  }
  0xd2   :  { %v161_v50 = vadd.f32 %v143_v45, %v142_v47  ;;  %v145_v53 = vmul.f32 %v129_v46, %v427_v17  ;;  %v144_v55 = vmul.f32 %v128_v49, %v417_v11  ;;  %v247_v57 = vmul.f32 %v130_v56, %v419_v12  ;;  %361 = vset.pattern.permute.xlu0 %v367_v21 }
  0xd3   :  { %v265_v58 = vadd.f32 %v246_v52, %v245_v51  ;;  %v248_v60 = vmul.f32 %v131_v54, %v429_v18  ;;  %v147_v61 = vmul.f32 %v131_v54, %v427_v17  ;;  %v146_v63 = vmul.f32 %v130_v56, %v417_v11 }
  0xd4   :  { %v164_v59 = vadd.f32 %v145_v53, %v144_v55  ;;  %v249_v1 = vmul.f32 %v132_v0, %v419_v12  ;;  %v250_v2 = vmul.f32 %v133_v62, %v429_v18  ;;  %v149_v5 = vmul.f32 %v133_v62, %v427_v17 }
  0xd5   :  { %257 = vadd.xlane.f32.xlu1 %v256_v31  ;;  %156 = vadd.xlane.f32.xlu0 %v155_v34  ;;  %v268_v3 = vadd.f32 %v248_v60, %v247_v57  ;;  %v167_v4 = vadd.f32 %v147_v61, %v146_v63  ;;  %v148_v7 = vmul.f32 %v132_v0, %v417_v11  ;;  %v184_v27 = vlaneseq }
  0xd6   :  { %v271_v8 = vadd.f32 %v250_v2, %v249_v1  ;;  %v251_v13 = vmul.f32 %v134_v9, %v419_v12  ;;  %v252_v14 = vmul.f32 %v135_v6, %v429_v18  ;;  %v151_v15 = vmul.f32 %v135_v6, %v427_v17  ;;  %v330_v6 = vld [vmem:[%s522_s3] sm:$0xff] }
  0xd7   :  { %v170_v10 = vadd.f32 %v149_v5, %v148_v7  ;;  %v150_v16 = vmul.f32 %v134_v9, %v417_v11  ;;  %v185_v17 = vand.u32 127, %v184_v27  ;;  %v187_v29 = vshrl.u32 %v184_v27, 7 }
  0xd8   :  { %v274_v19 = vadd.f32 %v252_v14, %v251_v13 }
  0xd9   :  { %260 = vadd.xlane.f32.xlu1 %v259_v43  ;;  %159 = vadd.xlane.f32.xlu0 %v158_v44  ;;  %v173_v20 = vadd.f32 %v151_v15, %v150_v16  ;;  %v188_v11 = vsub.s32 %v185_v17, %v187_v29 }
  0xdd   :  { %263 = vadd.xlane.f32.xlu1 %v262_v48  ;;  %162 = vadd.xlane.f32.xlu0 %v161_v50 }
  0xe1   :  { %266 = vadd.xlane.f32.xlu1 %v265_v58  ;;  %165 = vadd.xlane.f32.xlu0 %v164_v59 }
  0xe5   :  { %269 = vadd.xlane.f32.xlu1 %v268_v3  ;;  %168 = vadd.xlane.f32.xlu0 %v167_v4 }
  0xe9   :  { %272 = vadd.xlane.f32.xlu1 %v271_v8  ;;  %171 = vadd.xlane.f32.xlu0 %v170_v10 }
  0xed   :  { %275 = vadd.xlane.f32.xlu1 %v274_v19  ;;  %174 = vadd.xlane.f32.xlu0 %v173_v20 }
 0x15a   :  { %v255_v22 = vpop.xlane.xlu1 %254  ;;  %v154_v23 = vpop.xlane.xlu0 %153 }
 0x15b   :  { %v288_v34 = vrot.slane %v255_v22, %v188_v11  ;;  %v189_v39 = vrot.slane %v154_v23, %v188_v11 }
 0x15e   :  { %v258_v24 = vpop.xlane.xlu1 %257  ;;  %v157_v25 = vpop.xlane.xlu0 %156 }
 0x15f   :  { %v292_v35 = vrot.slane %v258_v24, %v188_v11  ;;  %v193_v36 = vrot.slane %v157_v25, %v188_v11 }
 0x161   :  { %v317_v46 = vsel %vm218_vm2, %v292_v35, %v288_v34  ;;  %v219_v47 = vsel %vm218_vm2, %v193_v36, %v189_v39 }
 0x162   :  { %v261_v26 = vpop.xlane.xlu1 %260  ;;  %v160_v12 = vpop.xlane.xlu0 %159 }
 0x163   :  { %v296_v37 = vrot.slane %v261_v26, %v188_v11  ;;  %v197_v38 = vrot.slane %v160_v12, %v188_v11 }
 0x165   :  { %v318_v50 = vsel %vm220_vm3, %v296_v37, %v317_v46  ;;  %v221_v51 = vsel %vm220_vm3, %v197_v38, %v219_v47 }
 0x166   :  { %v264_v18 = vpop.xlane.xlu1 %263  ;;  %v163_v28 = vpop.xlane.xlu0 %162 }
 0x167   :  { %v300_v40 = vrot.slane %v264_v18, %v188_v11  ;;  %v201_v41 = vrot.slane %v163_v28, %v188_v11 }
 0x169   :  { %v319_v54 = vsel %vm222_vm4, %v300_v40, %v318_v50  ;;  %v223_v55 = vsel %vm222_vm4, %v201_v41, %v221_v51 }
 0x16a   :  { %v267_v30 = vpop.xlane.xlu1 %266  ;;  %v166_v31 = vpop.xlane.xlu0 %165 }
 0x16b   :  { %v304_v42 = vrot.slane %v267_v30, %v188_v11  ;;  %v205_v43 = vrot.slane %v166_v31, %v188_v11 }
 0x16d   :  { %v320_v56 = vsel %vm224_vm5, %v304_v42, %v319_v54  ;;  %v225_v57 = vsel %vm224_vm5, %v205_v43, %v223_v55 }
 0x16e   :  { %v270_v32 = vpop.xlane.xlu1 %269  ;;  %v169_v33 = vpop.xlane.xlu0 %168 }
 0x16f   :  { %v308_v48 = vrot.slane %v270_v32, %v188_v11  ;;  %v209_v49 = vrot.slane %v169_v33, %v188_v11 }
 0x171   :  { %v321_v60 = vsel %vm226_vm6, %v308_v48, %v320_v56  ;;  %v227_v61 = vsel %vm226_vm6, %v209_v49, %v225_v57 }
 0x172   :  { %v273_v44 = vpop.xlane.xlu1 %272  ;;  %v172_v45 = vpop.xlane.xlu0 %171 }
 0x173   :  { %v312_v52 = vrot.slane %v273_v44, %v188_v11  ;;  %v213_v53 = vrot.slane %v172_v45, %v188_v11 }
 0x175   :  { %v322_v0 = vsel %vm228_vm7, %v312_v52, %v321_v60  ;;  %v229_v1 = vsel %vm228_vm7, %v213_v53, %v227_v61 }
 0x176   :  { %v276_v58 = vpop.xlane.xlu1 %275  ;;  %v175_v59 = vpop.xlane.xlu0 %174 }
 0x177   :  { %v316_v62 = vrot.slane %v276_v58, %v188_v11  ;;  %v217_v63 = vrot.slane %v175_v59, %v188_v11 }
 0x179   :  { %v323_v2 = vsel %vm230_vm8, %v316_v62, %v322_v0  ;;  %v231_v3 = vsel %vm230_vm8, %v217_v63, %v229_v1 }
 0x17a   :  { %v325_v4 = vsel %vm233_vm9, %v323_v2, 0.0  ;;  %v234_v5 = vsel %vm233_vm9, %v231_v3, 0.0 }
 0x17b   :  { %326 = vadd.xlane.f32.xlu1 %v325_v4  ;;  %235 = vadd.xlane.f32.xlu0 %v234_v5 }
 0x191   :  { %333 = vperm.xlu0 %361, %v330_v6  }
 0x204   :  { %v236_v7 = vpop.xlane.xlu0 %235  ;;  %v327_v8 = vpop.xlane.xlu1 %326 }
 0x205   :  { %v329_v9 = vsel %vm328_vm10, %v236_v7, %v327_v8 }
 0x20c   :  { %v334_v10 = vpop.permute.xlu0 %333 }
 0x20d   :  { %v336_v13 = vadd.f32 %v334_v10, %v329_v9 }
 0x20f   :  { %v337_v14 = vsub.f32 0.0, %v336_v13 }
 0x211   :  { %v338_v15 = vmul.f32 1.442695, %v337_v14 }
 0x213   :  { %362 = vpow2.f32 %v338_v15 }
 0x220   :  { %v363_v16 = vpop.eup %362 }
 0x221   :  { %v340_v19 = vadd.f32 1.0, %v363_v16 }
 0x223   :  { %364 = vrcp.f32 %v340_v19 }
 0x230   :  { %v365_v20 = vpop.eup %364 }
 0x231   :  { %344 = vst.msk [vmem:[%s523_s4] sm:$0xff] %vm343_vm11, %v365_v20 }

</bundles_post_ra>
